<compile_context>
chip_gen: v7x
topology: tpu7x:2x2x1
jax: 0.10.0
libtpu: 0.0.40
codegen_flags: <defaults>
</compile_context>

<pallas_src>
import functools
import math

import jax
import jax.numpy as jnp
from jax import lax
from jax.experimental import pallas as pl
from jax.experimental.pallas import tpu as pltpu

LN_EPS = 1e-5  # PyTorch nn.LayerNorm default


def _layernorm_rows(x, gamma, beta):
    # x: (rows, H); gamma/beta: (1, H); all math in f32
    mu = jnp.mean(x, axis=-1, keepdims=True)
    var = jnp.mean((x - mu) * (x - mu), axis=-1, keepdims=True)
    return (x - mu) * lax.rsqrt(var + LN_EPS) * gamma + beta


def cross_attention_kernel(
    # data (one batch tile per grid step)
    qg_ref,     # (TB, 2*Qd)   = [query | goal] per row
    vis_ref,    # (TB*P, Cd)   flattened visual patches
    # params (broadcast across grid: constant index_map -> fetched once)
    wqg_ref,    # (2*Qd, 3H)   block-diag [[Wq,0,0],[0,Wkg,Wvg]]
    wvis_ref,   # (Cd, 2H)     fused [Wv_visual | Wk_visual]  (V low, K high)
    wo_ref,     # (H, OUT_W)   Wo zero-padded to lane-dense OUT_W
    pp_ref,     # (8, PW)      packed small params (biases + LayerNorm gamma/beta)
    # output
    out_ref,    # (TB, OUT_W)
    *, scale, P, H,
):
    TB = qg_ref.shape[0]
    H2 = 2 * H
    out_w = out_ref.shape[1]

    # ---- packed small params (all lower-lane slices: no rotates) -------------
    b_qg = pp_ref[0:1, :3 * H]       # fused [bq | bkg | bvg]
    b_vis = pp_ref[1:2, :H2]         # fused [bv_vis | bk_vis]
    b_o = pp_ref[2:3, :out_w]        # bo zero-padded to OUT_W
    g1 = pp_ref[3:4, :H]
    b1 = pp_ref[4:5, :H]
    g2 = pp_ref[5:6, :H]
    b2 = pp_ref[6:7, :H]

    # ---- fused query/goal projection: one MXU pass, layout [qh | kg | vg] ----
    qg = jnp.dot(qg_ref[...], wqg_ref[...],
                 preferred_element_type=jnp.float32) + b_qg        # (TB, 3H)
    qh = qg[:, :H]                    # lanes [0, H)        : no rotate
    vg = qg[:, H2:3 * H]              # lanes [2H, 3H)      : lane-tile aligned
    # k_goal stays in lanes [H, 2H) and is never sliced (consumed via qn_ext).

    # ---- LayerNorm1; fold the softmax scale into the normalized query -------
    qn = _layernorm_rows(qh, g1, b1) * scale                       # (TB, H)
    # Place qn in the *upper* H lanes so it lines up with the K halves of both
    # fused projections; lower lanes are zero so V / qh halves contribute 0.
    qn_ext = jnp.concatenate([jnp.zeros_like(qn), qn], axis=-1)    # (TB, 2H)

    # ---- fused visual K|V projection, lane-dense N = 2H ----------------------
    kv_vis = jnp.dot(vis_ref[...], wvis_ref[...],
                     preferred_element_type=jnp.float32) + b_vis   # (TB*P, 2H)
    kv_vis = kv_vis.reshape(TB, P, H2)                             # tile-aligned for P=8

    # ---- attention scores: full-width reduces, no K slicing ------------------
    s_vis = jnp.sum(qn_ext[:, None, :] * kv_vis, axis=-1)          # (TB, P)
    s_goal = jnp.sum(qn_ext * qg[:, :H2], axis=-1, keepdims=True)  # (TB, 1)

    # ---- joint softmax (shared max / denominator, no concat round-trip) ------
    m = jnp.maximum(jnp.max(s_vis, axis=-1, keepdims=True), s_goal)
    e_vis = jnp.exp(s_vis - m)                                     # (TB, P)
    e_goal = jnp.exp(s_goal - m)                                   # (TB, 1)
    inv = pl.reciprocal(jnp.sum(e_vis, axis=-1, keepdims=True) + e_goal,
                        approx=False)                              # exact: 1e-4 tol
    a_vis = e_vis * inv
    a_goal = e_goal * inv

    # ---- weighted values: V halves are in lanes [0, H) -> no rotate ----------
    v_vis = kv_vis[:, :, :H]                                       # (TB, P, H)
    ctx = jnp.sum(a_vis[:, :, None] * v_vis, axis=1) + a_goal * vg  # (TB, H)

    # ---- LayerNorm2 + lane-dense output projection ---------------------------
    on = _layernorm_rows(ctx, g2, b2)
    out_ref[...] = jnp.dot(on.astype(wo_ref.dtype), wo_ref[...],
                           preferred_element_type=jnp.float32) + b_o


def cross_attention_pallas(query, visual_context, goal_context, params, *,
                           block_b=1024, matmul_dtype=jnp.float32,
                           core_parallel=False):
    """block_b: batch-tile rows (use ~1024 on v5e/v6e, ~512 on v7x: 64 MiB VMEM).
    matmul_dtype: jnp.bfloat16 casts MXU operands (v6e/v7x); accumulation stays f32.
    core_parallel: mark the batch grid axis CORE_PARALLEL (v7x 2-TC sharding)."""
    B, _, Qd = query.shape
    _, P, Cd = visual_context.shape
    H = params["wq"].shape[1]
    scale = float(H) ** (-0.5)
    out_w = ((H + 127) // 128) * 128      # lane-dense output width

    # ---- batch tiling ---------------------------------------------------------
    block_b = max(8, (block_b // 8) * 8)  # keep tile sublane-aligned when tiled
    if B <= block_b:
        tb, Bp = B, B
    else:
        tb = block_b
        Bp = pl.cdiv(B, tb) * tb

    # ---- data prep: fused [query|goal] rows, flattened visual ---------------
    qg_in = jnp.concatenate(
        [query.reshape(B, Qd), goal_context.reshape(B, Qd)], axis=-1)   # (B, 2Qd)
    visf = visual_context.reshape(B * P, Cd)
    if Bp != B:
        pad = Bp - B
        qg_in = jnp.pad(qg_in, ((0, pad), (0, 0)))
        visf = jnp.pad(visf, ((0, pad * P), (0, 0)))

    # ---- fused / packed weights (built once in the wrapper) ------------------
    f32 = jnp.float32
    zqh = jnp.zeros((Qd, H), f32)
    w_qg = jnp.concatenate(
        [jnp.concatenate([params["wq"], zqh, zqh], axis=1),
         jnp.concatenate([zqh, params["wkg"], params["wvg"]], axis=1)],
        axis=0)                                                        # (2Qd, 3H)
    b_qg = jnp.concatenate([params["bq"], params["bkg"], params["bvg"]], axis=1)
    w_vis = jnp.concatenate([params["wvv"], params["wkv"]], axis=1)    # [V|K] (Cd,2H)
    b_vis = jnp.concatenate([params["bvv"], params["bkv"]], axis=1)    # (1, 2H)
    wo_p, bo_p = params["wo"], params["bo"]
    if out_w != H:
        wo_p = jnp.pad(wo_p, ((0, 0), (0, out_w - H)))
        bo_p = jnp.pad(bo_p, ((0, 0), (0, out_w - H)))

    pw = max(3 * H, out_w)
    def _row(x):
        return jnp.pad(x.astype(f32), ((0, 0), (0, pw - x.shape[1])))
    ppack = jnp.concatenate(
        [_row(b_qg), _row(b_vis), _row(bo_p),
         _row(params["g1"]), _row(params["b1"]),
         _row(params["g2"]), _row(params["b2"]),
         jnp.zeros((1, pw), f32)], axis=0)                             # (8, pw)

    # MXU operand dtype (biases / LN params / accumulation remain f32).
    md = matmul_dtype
    qg_in = qg_in.astype(md)
    visf = visf.astype(md)
    w_qg = w_qg.astype(md)
    w_vis = w_vis.astype(md)
    wo_p = wo_p.astype(md)

    # ---- scoped VMEM budget (defaults of 16/32 MiB are too small for big TB) -
    if tb >= 768:
        vmem_limit = 100 * (1 << 20)   # big tiles: v5e/v6e (128 MiB physical)
    elif tb >= 256:
        vmem_limit = 56 * (1 << 20)    # fits v7x's 64 MiB physical VMEM
    else:
        vmem_limit = 32 * (1 << 20)

    dim_sem = (pltpu.CORE_PARALLEL,) if core_parallel else ("parallel",)

    grid = (Bp // tb,)
    kernel = functools.partial(cross_attention_kernel, scale=scale, P=P, H=H)

    out2 = pl.pallas_call(
        kernel,
        out_shape=jax.ShapeDtypeStruct((Bp, out_w), jnp.float32),
        grid_spec=pltpu.PrefetchScalarGridSpec(
            num_scalar_prefetch=0,
            grid=grid,
            in_specs=[
                pl.BlockSpec((tb, 2 * Qd), lambda i: (i, 0)),       # [q|goal]
                pl.BlockSpec((tb * P, Cd), lambda i: (i, 0)),       # visual (flat)
                pl.BlockSpec((2 * Qd, 3 * H), lambda i: (0, 0)),    # fused q/goal W
                pl.BlockSpec((Cd, 2 * H), lambda i: (0, 0)),        # fused [Wv|Wk] visual
                pl.BlockSpec((H, out_w), lambda i: (0, 0)),         # Wo (lane-dense)
                pl.BlockSpec((8, pw), lambda i: (0, 0)),            # packed params
            ],
            out_specs=pl.BlockSpec((tb, out_w), lambda i: (i, 0)),
        ),
        compiler_params=pltpu.CompilerParams(
            dimension_semantics=dim_sem,
            vmem_limit_bytes=vmem_limit,
        ),
    )(qg_in, visf, w_qg, w_vis, wo_p, ppack)

    return out2[:B, :H].reshape(B, 1, H)


# ----- pure-JAX reference (for correctness check) -----
def cross_attention_ref(query, visual_context, goal_context, params):
    H = params["wq"].shape[1]
    scale = float(H) ** (-0.5)

    def ln(x, g, b):
        mu = jnp.mean(x, axis=-1, keepdims=True)
        var = jnp.mean((x - mu) ** 2, axis=-1, keepdims=True)
        return (x - mu) / jnp.sqrt(var + LN_EPS) * g + b

    q = query @ params["wq"] + params["bq"]
    q = ln(q, params["g1"], params["b1"])
    kv = visual_context @ params["wkv"] + params["bkv"]
    vv = visual_context @ params["wvv"] + params["bvv"]
    kg = goal_context @ params["wkg"] + params["bkg"]
    vg = goal_context @ params["wvg"] + params["bvg"]
    k = jnp.concatenate([kv, kg], axis=1)
    v = jnp.concatenate([vv, vg], axis=1)
    attn = jnp.einsum("bqh,bkh->bqk", q, k) * scale
    attn = jax.nn.softmax(attn, axis=-1)
    out = jnp.einsum("bqk,bkh->bqh", attn, v)
    out = ln(out, params["g2"], params["b2"])
    return out @ params["wo"] + params["bo"]


def init_params(key, query_dim, context_dim, hidden_dim):
    """Deterministic synthetic init (PyTorch Linear-style uniform bounds)."""
    def linear(k, fan_in, fan_out):
        bound = 1.0 / math.sqrt(fan_in)
        kw, kb = jax.random.split(k)
        w = jax.random.uniform(kw, (fan_in, fan_out), jnp.float32, -bound, bound)
        b = jax.random.uniform(kb, (1, fan_out), jnp.float32, -bound, bound)
        return w, b

    ks = jax.random.split(key, 6)
    params = {}
    params["wq"], params["bq"] = linear(ks[0], query_dim, hidden_dim)
    params["wkv"], params["bkv"] = linear(ks[1], context_dim, hidden_dim)
    params["wvv"], params["bvv"] = linear(ks[2], context_dim, hidden_dim)
    params["wkg"], params["bkg"] = linear(ks[3], query_dim, hidden_dim)
    params["wvg"], params["bvg"] = linear(ks[4], query_dim, hidden_dim)
    params["wo"], params["bo"] = linear(ks[5], hidden_dim, hidden_dim)
    params["g1"] = jnp.ones((1, hidden_dim), jnp.float32)
    params["b1"] = jnp.zeros((1, hidden_dim), jnp.float32)
    params["g2"] = jnp.ones((1, hidden_dim), jnp.float32)
    params["b2"] = jnp.zeros((1, hidden_dim), jnp.float32)
    return params


if __name__ == "__main__":
    B = 2
    query_dim = 32
    context_dim = 16
    hidden_dim = 64      # divisible by num_heads=8 (heads unused in forward)
    num_patches = 8      # P=8 keeps the in-kernel (TB*P,2H)->(TB,P,2H) reshape tile-aligned

    key = jax.random.PRNGKey(0)
    k_q, k_vis, k_goal, k_p = jax.random.split(key, 4)

    query = jax.random.normal(k_q, (B, 1, query_dim), jnp.float32)
    visual_context = jax.random.normal(k_vis, (B, num_patches, context_dim), jnp.float32)
    goal_context = jax.random.normal(k_goal, (B, 1, query_dim), jnp.float32)
    params = init_params(k_p, query_dim, context_dim, hidden_dim)

    ref = cross_attention_ref(query, visual_context, goal_context, params)

    # 1) f32 path, single batch tile.
    out = cross_attention_pallas(query, visual_context, goal_context, params)
    out = jax.block_until_ready(out)
    assert out.shape == (B, 1, hidden_dim)
    assert jnp.allclose(out, ref, rtol=1e-4, atol=1e-4), (
        f"max abs err {jnp.max(jnp.abs(out - ref))}")

    # 2) multi-tile grid + batch padding path (tiny tile just to exercise tiling).
    B2 = 20
    kq2, kv2, kg2 = jax.random.split(jax.random.PRNGKey(1), 3)
    q2 = jax.random.normal(kq2, (B2, 1, query_dim), jnp.float32)
    v2 = jax.random.normal(kv2, (B2, num_patches, context_dim), jnp.float32)
    g2 = jax.random.normal(kg2, (B2, 1, query_dim), jnp.float32)
    ref2 = cross_attention_ref(q2, v2, g2, params)
    out2 = jax.block_until_ready(
        cross_attention_pallas(q2, v2, g2, params, block_b=8))
    assert out2.shape == (B2, 1, hidden_dim)
    assert jnp.allclose(out2, ref2, rtol=1e-4, atol=1e-4), (
        f"max abs err {jnp.max(jnp.abs(out2 - ref2))}")

    # 3) bf16 MXU-operand path (v6e/v7x); f32 accumulation, loose tolerance.
    out_bf = jax.block_until_ready(
        cross_attention_pallas(query, visual_context, goal_context, params,
                               matmul_dtype=jnp.bfloat16))
    assert bool(jnp.all(jnp.isfinite(out_bf)))
    assert float(jnp.max(jnp.abs(out_bf - ref))) < 0.15

    print("KERNEL_OK")
</pallas_src>

<mosaic_0001>
module attributes {stable_mosaic.version = 11 : i64} {
  func.func @cross_attention_kernel(%arg0: i32, %arg1: memref<2x64xf32, #tpu.memory_space<vmem>>, %arg2: memref<16x16xf32, #tpu.memory_space<vmem>>, %arg3: memref<64x192xf32, #tpu.memory_space<vmem>>, %arg4: memref<16x128xf32, #tpu.memory_space<vmem>>, %arg5: memref<64x128xf32, #tpu.memory_space<vmem>>, %arg6: memref<8x192xf32, #tpu.memory_space<vmem>>, %arg7: memref<2x128xf32, #tpu.memory_space<vmem>>) attributes {dimension_semantics = [#tpu.dimension_semantics<parallel>], iteration_bounds = array<i64: 1>, scalar_prefetch = 0 : i64, scratch_operands = 0 : i64, tpu.core_type = #tpu.core_type<tc>, window_params = [{transform_indices = @transform_0, window_bounds = array<i64: 2, 64>}, {transform_indices = @transform_1, window_bounds = array<i64: 16, 16>}, {pipeline_mode = #tpu.pipeline_mode<synchronous>, transform_indices = @transform_2, window_bounds = array<i64: 64, 192>}, {pipeline_mode = #tpu.pipeline_mode<synchronous>, transform_indices = @transform_3, window_bounds = array<i64: 16, 128>}, {pipeline_mode = #tpu.pipeline_mode<synchronous>, transform_indices = @transform_4, window_bounds = array<i64: 64, 128>}, {pipeline_mode = #tpu.pipeline_mode<synchronous>, transform_indices = @transform_5, window_bounds = array<i64: 8, 192>}, {transform_indices = @transform_6, window_bounds = array<i64: 2, 128>}]} {
    %c0 = arith.constant 0 : index
    %c0_0 = arith.constant 0 : index
    %0 = vector.load %arg6[%c0, %c0_0] : memref<8x192xf32, #tpu.memory_space<vmem>>, vector<1x192xf32>
    %c1 = arith.constant 1 : index
    %c0_1 = arith.constant 0 : index
    %1 = vector.load %arg6[%c1, %c0_1] : memref<8x192xf32, #tpu.memory_space<vmem>>, vector<1x128xf32>
    %c2 = arith.constant 2 : index
    %c0_2 = arith.constant 0 : index
    %2 = vector.load %arg6[%c2, %c0_2] : memref<8x192xf32, #tpu.memory_space<vmem>>, vector<1x128xf32>
    %c3 = arith.constant 3 : index
    %c0_3 = arith.constant 0 : index
    %3 = vector.load %arg6[%c3, %c0_3] : memref<8x192xf32, #tpu.memory_space<vmem>>, vector<1x64xf32>
    %c4 = arith.constant 4 : index
    %c0_4 = arith.constant 0 : index
    %4 = vector.load %arg6[%c4, %c0_4] : memref<8x192xf32, #tpu.memory_space<vmem>>, vector<1x64xf32>
    %c5 = arith.constant 5 : index
    %c0_5 = arith.constant 0 : index
    %5 = vector.load %arg6[%c5, %c0_5] : memref<8x192xf32, #tpu.memory_space<vmem>>, vector<1x64xf32>
    %c6 = arith.constant 6 : index
    %c0_6 = arith.constant 0 : index
    %6 = vector.load %arg6[%c6, %c0_6] : memref<8x192xf32, #tpu.memory_space<vmem>>, vector<1x64xf32>
    %c0_7 = arith.constant 0 : index
    %c0_8 = arith.constant 0 : index
    %7 = vector.load %arg1[%c0_7, %c0_8] : memref<2x64xf32, #tpu.memory_space<vmem>>, vector<2x64xf32>
    %c0_9 = arith.constant 0 : index
    %c0_10 = arith.constant 0 : index
    %8 = vector.load %arg3[%c0_9, %c0_10] : memref<64x192xf32, #tpu.memory_space<vmem>>, vector<64x192xf32>
    %cst = arith.constant dense<0.000000e+00> : vector<2x192xf32>
    %9 = tpu.matmul %7, %8, %cst {dimension_numbers = #tpu.dot_dimension_numbers<[1], [0], [0], [1], [0, 0, 1, 1], [], []>} : vector<2x64xf32>, vector<64x192xf32>, vector<2x192xf32> -> vector<2x192xf32>
    %10 = vector.broadcast %0 : vector<1x192xf32> to vector<2x192xf32>
    %11 = arith.addf %9, %10 : vector<2x192xf32>
    %12 = vector.extract_strided_slice %11 {offsets = [0, 0], sizes = [2, 64], strides = [1, 1]} : vector<2x192xf32> to vector<2x64xf32>
    %13 = vector.extract_strided_slice %11 {offsets = [0, 128], sizes = [2, 64], strides = [1, 1]} : vector<2x192xf32> to vector<2x64xf32>
    %cst_11 = arith.constant dense<0.000000e+00> : vector<2xf32>
    %14 = vector.multi_reduction <add>, %12, %cst_11 [1] : vector<2x64xf32> to vector<2xf32>
    %15 = vector.shape_cast %14 : vector<2xf32> to vector<2x1xf32>
    %cst_12 = arith.constant 6.400000e+01 : f32
    %16 = vector.broadcast %cst_12 : f32 to vector<2x1xf32>
    %17 = arith.divf %15, %16 : vector<2x1xf32>
    %18 = vector.broadcast %17 : vector<2x1xf32> to vector<2x64xf32>
    %19 = arith.subf %12, %18 : vector<2x64xf32>
    %20 = vector.broadcast %17 : vector<2x1xf32> to vector<2x64xf32>
    %21 = arith.subf %12, %20 : vector<2x64xf32>
    %22 = arith.mulf %19, %21 : vector<2x64xf32>
    %cst_13 = arith.constant dense<0.000000e+00> : vector<2xf32>
    %23 = vector.multi_reduction <add>, %22, %cst_13 [1] : vector<2x64xf32> to vector<2xf32>
    %24 = vector.shape_cast %23 : vector<2xf32> to vector<2x1xf32>
    %cst_14 = arith.constant 6.400000e+01 : f32
    %25 = vector.broadcast %cst_14 : f32 to vector<2x1xf32>
    %26 = arith.divf %24, %25 : vector<2x1xf32>
    %27 = vector.broadcast %17 : vector<2x1xf32> to vector<2x64xf32>
    %28 = arith.subf %12, %27 : vector<2x64xf32>
    %cst_15 = arith.constant 9.99999974E-6 : f32
    %29 = vector.broadcast %cst_15 : f32 to vector<2x1xf32>
    %30 = arith.addf %26, %29 : vector<2x1xf32>
    %31 = math.rsqrt %30 : vector<2x1xf32>
    %32 = vector.broadcast %31 : vector<2x1xf32> to vector<2x64xf32>
    %33 = arith.mulf %28, %32 : vector<2x64xf32>
    %34 = vector.broadcast %3 : vector<1x64xf32> to vector<2x64xf32>
    %35 = arith.mulf %33, %34 : vector<2x64xf32>
    %36 = vector.broadcast %4 : vector<1x64xf32> to vector<2x64xf32>
    %37 = arith.addf %35, %36 : vector<2x64xf32>
    %cst_16 = arith.constant 1.250000e-01 : f32
    %38 = vector.broadcast %cst_16 : f32 to vector<2x64xf32>
    %39 = arith.mulf %37, %38 : vector<2x64xf32>
    %cst_17 = arith.constant 0.000000e+00 : f32
    %40 = vector.broadcast %cst_17 : f32 to vector<2x64xf32>
    %41 = tpu.concatenate %40, %39 in 1 : vector<2x64xf32>, vector<2x64xf32> -> vector<2x128xf32>
    %c0_18 = arith.constant 0 : index
    %c0_19 = arith.constant 0 : index
    %42 = vector.load %arg2[%c0_18, %c0_19] : memref<16x16xf32, #tpu.memory_space<vmem>>, vector<16x16xf32>
    %c0_20 = arith.constant 0 : index
    %c0_21 = arith.constant 0 : index
    %43 = vector.load %arg4[%c0_20, %c0_21] : memref<16x128xf32, #tpu.memory_space<vmem>>, vector<16x128xf32>
    %cst_22 = arith.constant dense<0.000000e+00> : vector<16x128xf32>
    %44 = tpu.matmul %42, %43, %cst_22 {dimension_numbers = #tpu.dot_dimension_numbers<[1], [0], [0], [1], [0, 0, 1, 1], [], []>} : vector<16x16xf32>, vector<16x128xf32>, vector<16x128xf32> -> vector<16x128xf32>
    %45 = vector.broadcast %1 : vector<1x128xf32> to vector<16x128xf32>
    %46 = arith.addf %44, %45 : vector<16x128xf32>
    %47 = vector.shape_cast %46 : vector<16x128xf32> to vector<2x8x128xf32>
    %48 = vector.shape_cast %41 : vector<2x128xf32> to vector<2x1x128xf32>
    %49 = vector.broadcast %48 : vector<2x1x128xf32> to vector<2x8x128xf32>
    %50 = arith.mulf %49, %47 : vector<2x8x128xf32>
    %cst_23 = arith.constant dense<0.000000e+00> : vector<2x8xf32>
    %51 = vector.multi_reduction <add>, %50, %cst_23 [2] : vector<2x8x128xf32> to vector<2x8xf32>
    %52 = vector.extract_strided_slice %11 {offsets = [0, 0], sizes = [2, 128], strides = [1, 1]} : vector<2x192xf32> to vector<2x128xf32>
    %53 = arith.mulf %41, %52 : vector<2x128xf32>
    %cst_24 = arith.constant dense<0.000000e+00> : vector<2xf32>
    %54 = vector.multi_reduction <add>, %53, %cst_24 [1] : vector<2x128xf32> to vector<2xf32>
    %55 = vector.shape_cast %54 : vector<2xf32> to vector<2x1xf32>
    %cst_25 = arith.constant dense<0xFF800000> : vector<2xf32>
    %56 = vector.multi_reduction <maximumf>, %51, %cst_25 [1] : vector<2x8xf32> to vector<2xf32>
    %57 = vector.shape_cast %56 : vector<2xf32> to vector<2x1xf32>
    %58 = arith.maximumf %57, %55 : vector<2x1xf32>
    %59 = vector.broadcast %58 : vector<2x1xf32> to vector<2x8xf32>
    %60 = arith.subf %51, %59 : vector<2x8xf32>
    %61 = math.exp %60 : vector<2x8xf32>
    %62 = arith.subf %55, %58 : vector<2x1xf32>
    %63 = math.exp %62 : vector<2x1xf32>
    %cst_26 = arith.constant dense<0.000000e+00> : vector<2xf32>
    %64 = vector.multi_reduction <add>, %61, %cst_26 [1] : vector<2x8xf32> to vector<2xf32>
    %65 = vector.shape_cast %64 : vector<2xf32> to vector<2x1xf32>
    %66 = arith.addf %65, %63 : vector<2x1xf32>
    %67 = tpu.reciprocal %66 : vector<2x1xf32> -> vector<2x1xf32>
    %68 = vector.broadcast %67 : vector<2x1xf32> to vector<2x8xf32>
    %69 = arith.mulf %61, %68 : vector<2x8xf32>
    %70 = arith.mulf %63, %67 : vector<2x1xf32>
    %71 = vector.extract_strided_slice %47 {offsets = [0, 0, 0], sizes = [2, 8, 64], strides = [1, 1, 1]} : vector<2x8x128xf32> to vector<2x8x64xf32>
    %72 = vector.shape_cast %69 : vector<2x8xf32> to vector<2x8x1xf32>
    %73 = vector.broadcast %72 : vector<2x8x1xf32> to vector<2x8x64xf32>
    %74 = arith.mulf %73, %71 : vector<2x8x64xf32>
    %cst_27 = arith.constant dense<0.000000e+00> : vector<2x64xf32>
    %75 = vector.multi_reduction <add>, %74, %cst_27 [1] : vector<2x8x64xf32> to vector<2x64xf32>
    %76 = vector.broadcast %70 : vector<2x1xf32> to vector<2x64xf32>
    %77 = arith.mulf %76, %13 : vector<2x64xf32>
    %78 = arith.addf %75, %77 : vector<2x64xf32>
    %cst_28 = arith.constant dense<0.000000e+00> : vector<2xf32>
    %79 = vector.multi_reduction <add>, %78, %cst_28 [1] : vector<2x64xf32> to vector<2xf32>
    %80 = vector.shape_cast %79 : vector<2xf32> to vector<2x1xf32>
    %cst_29 = arith.constant 6.400000e+01 : f32
    %81 = vector.broadcast %cst_29 : f32 to vector<2x1xf32>
    %82 = arith.divf %80, %81 : vector<2x1xf32>
    %83 = vector.broadcast %82 : vector<2x1xf32> to vector<2x64xf32>
    %84 = arith.subf %78, %83 : vector<2x64xf32>
    %85 = vector.broadcast %82 : vector<2x1xf32> to vector<2x64xf32>
    %86 = arith.subf %78, %85 : vector<2x64xf32>
    %87 = arith.mulf %84, %86 : vector<2x64xf32>
    %cst_30 = arith.constant dense<0.000000e+00> : vector<2xf32>
    %88 = vector.multi_reduction <add>, %87, %cst_30 [1] : vector<2x64xf32> to vector<2xf32>
    %89 = vector.shape_cast %88 : vector<2xf32> to vector<2x1xf32>
    %cst_31 = arith.constant 6.400000e+01 : f32
    %90 = vector.broadcast %cst_31 : f32 to vector<2x1xf32>
    %91 = arith.divf %89, %90 : vector<2x1xf32>
    %92 = vector.broadcast %82 : vector<2x1xf32> to vector<2x64xf32>
    %93 = arith.subf %78, %92 : vector<2x64xf32>
    %cst_32 = arith.constant 9.99999974E-6 : f32
    %94 = vector.broadcast %cst_32 : f32 to vector<2x1xf32>
    %95 = arith.addf %91, %94 : vector<2x1xf32>
    %96 = math.rsqrt %95 : vector<2x1xf32>
    %97 = vector.broadcast %96 : vector<2x1xf32> to vector<2x64xf32>
    %98 = arith.mulf %93, %97 : vector<2x64xf32>
    %99 = vector.broadcast %5 : vector<1x64xf32> to vector<2x64xf32>
    %100 = arith.mulf %98, %99 : vector<2x64xf32>
    %101 = vector.broadcast %6 : vector<1x64xf32> to vector<2x64xf32>
    %102 = arith.addf %100, %101 : vector<2x64xf32>
    %c0_33 = arith.constant 0 : index
    %c0_34 = arith.constant 0 : index
    %103 = vector.load %arg5[%c0_33, %c0_34] : memref<64x128xf32, #tpu.memory_space<vmem>>, vector<64x128xf32>
    %cst_35 = arith.constant dense<0.000000e+00> : vector<2x128xf32>
    %104 = tpu.matmul %102, %103, %cst_35 {dimension_numbers = #tpu.dot_dimension_numbers<[1], [0], [0], [1], [0, 0, 1, 1], [], []>} : vector<2x64xf32>, vector<64x128xf32>, vector<2x128xf32> -> vector<2x128xf32>
    %105 = vector.broadcast %2 : vector<1x128xf32> to vector<2x128xf32>
    %106 = arith.addf %104, %105 : vector<2x128xf32>
    %c0_36 = arith.constant 0 : index
    %c0_37 = arith.constant 0 : index
    %107 = vector.load %arg7[%c0_36, %c0_37] : memref<2x128xf32, #tpu.memory_space<vmem>>, vector<2x128xf32>
    tpu.vector_store %arg7[%c0_36, %c0_37], %106 {strides = array<i32>} : memref<2x128xf32, #tpu.memory_space<vmem>>, vector<2x128xf32>,
    return
  }
  func.func @transform_0(%arg0: i32) -> (i32, i32) {
    %c0_i32 = arith.constant 0 : i32
    %c0_i32_0 = arith.constant 0 : i32
    return %arg0, %c0_i32 : i32, i32
  }
  func.func @transform_1(%arg0: i32) -> (i32, i32) {
    %c0_i32 = arith.constant 0 : i32
    %c0_i32_0 = arith.constant 0 : i32
    return %arg0, %c0_i32 : i32, i32
  }
  func.func @transform_2(%arg0: i32) -> (i32, i32) {
    %c0_i32 = arith.constant 0 : i32
    %c0_i32_0 = arith.constant 0 : i32
    %c0_i32_1 = arith.constant 0 : i32
    return %c0_i32, %c0_i32_0 : i32, i32
  }
  func.func @transform_3(%arg0: i32) -> (i32, i32) {
    %c0_i32 = arith.constant 0 : i32
    %c0_i32_0 = arith.constant 0 : i32
    %c0_i32_1 = arith.constant 0 : i32
    return %c0_i32, %c0_i32_0 : i32, i32
  }
  func.func @transform_4(%arg0: i32) -> (i32, i32) {
    %c0_i32 = arith.constant 0 : i32
    %c0_i32_0 = arith.constant 0 : i32
    %c0_i32_1 = arith.constant 0 : i32
    return %c0_i32, %c0_i32_0 : i32, i32
  }
  func.func @transform_5(%arg0: i32) -> (i32, i32) {
    %c0_i32 = arith.constant 0 : i32
    %c0_i32_0 = arith.constant 0 : i32
    %c0_i32_1 = arith.constant 0 : i32
    return %c0_i32, %c0_i32_0 : i32, i32
  }
  func.func @transform_6(%arg0: i32) -> (i32, i32) {
    %c0_i32 = arith.constant 0 : i32
    %c0_i32_0 = arith.constant 0 : i32
    return %arg0, %c0_i32 : i32, i32
  }
}

</mosaic_0001>

<bundles_post_ra>
// kernel: tpu_custom_call.1
= control target key start
LH: loop header
LB: loop body
LE: loop exit
PB: predicated region body
PF: predicated region fallthrough
CT: control target
= control target key end

     0   :  { %11 = vsyncpa [#allocation3], 0  ;;  %s1049_s0 = inlined_call_operand.hbm [shape: f32[2,64], index: 0, kind: input, shape index: {}]   ;;  %s1050_s1 = inlined_call_operand.hbm [shape: f32[16,16], index: 1, kind: input, shape index: {}]   ;;  %s1051_s2 = inlined_call_operand.hbm [shape: f32[64,192], index: 2, kind: input, shape index: {}]   ;;  %s1052_s3 = inlined_call_operand.hbm [shape: f32[16,128], index: 3, kind: input, shape index: {}]   ;;  %s1053_s4 = inlined_call_operand.hbm [shape: f32[64,128], index: 4, kind: input, shape index: {}]   ;;  %s1054_s5 = inlined_call_operand.vmem [shape: f32[8,192], index: 5, kind: input, shape index: {}]   ;;  %s1055_s6 = inlined_call_operand.hbm [shape: f32[2,128], index: 6, kind: output, shape index: {}]  }
   0x1   :  { %12 = vsyncpa [#allocation6], 0 }
   0x2   :  { %13 = vsyncpa [#allocation9], 0 }
   0x3   :  { %14 = vsyncpa [#allocation4], 0  ;;  %s848_s21 = smov [#allocation5]   ;;  %s708_s25 = scalar_lea.hbm %s1050_s1, 256 }
   0x4   :  { %s30_s22 = sshll.u32 %s848_s21, 4  ;;  %p709_p0 = scmp.ne.s32.totalorder %s1050_s1, %s708_s25  ;;  %s31_s22 = int_to_ptr.vmem [resolvable:$true] %s30_s22 }
   0x5   :  { %p712_p1 = scmp.lt.u32.totalorder %s708_s25, %s1050_s1 }
   0x7   :  { %p714_p2 = pnand %p712_p1, %p709_p0 }
   0x9   :  { %717 = shalt.err (!%p714_p2)
}
   0xa   :  { %s718_s30 = scalar_lea.vmem %s31_s22, 256  ;;  %p723_p4 = scmp.lt.s32.totalorder %s31_s22, %s31_s22 }
   0xb   :  { %p719_p3 = scmp.ne.s32.totalorder %s31_s22, %s718_s30  ;;  %p724_p5 = scmp.lt.s32.totalorder %s718_s30, %s718_s30 }
   0xd   :  { %p725_p6 = por %p724_p5, %p723_p4 }
   0xf   :  { %p726_p7 = pnand %p725_p6, %p719_p3 }
  0x11   :  { %729 = shalt.err (!%p726_p7)
}
  0x12   :  { %s849_s7 = smov 128   ;;  %s850_s8 = smov 8  }
  0x13   :  { %36 = dma.hbm_to_vmem [thread:$0]  %s1050_s1, 256, %s31_s22, [#allocation6], %s849_s7, %s849_s7, %s850_s8  }
  0x14   :  { %s851_s11 = smov [#allocation8]   ;;  %s852_s13 = smov [#allocation2]  }
  0x15   :  { %s54_s12 = sshll.u32 %s851_s11, 4  ;;  %s21_s14 = sshll.u32 %s852_s13, 4  ;;  %s55_s12 = int_to_ptr.vmem [resolvable:$true] %s54_s12  ;;  %s22_s14 = int_to_ptr.vmem [resolvable:$true] %s21_s14 }
  0x16   :  { %s730_s17 = scalar_lea.hbm %s1052_s3, 256 }
  0x17   :  { %p731_p8 = scmp.ne.s32.totalorder %s1052_s3, %s730_s17  ;;  %p734_p9 = scmp.lt.u32.totalorder %s730_s17, %s1052_s3 }
  0x19   :  { %p736_p10 = pnand %p734_p9, %p731_p8 }
  0x1b   :  { %739 = shalt.err (!%p736_p10)
}
  0x1c   :  { %s740_s1 = scalar_lea.vmem %s55_s12, 256  ;;  %p745_p12 = scmp.lt.s32.totalorder %s55_s12, %s55_s12 }
  0x1d   :  { %p741_p11 = scmp.ne.s32.totalorder %s55_s12, %s740_s1  ;;  %p746_p13 = scmp.lt.s32.totalorder %s740_s1, %s740_s1 }
  0x1f   :  { %p747_p0 = por %p746_p13, %p745_p12 }
  0x21   :  { %p748_p1 = pnand %p747_p0, %p741_p11 }
  0x23   :  { %751 = shalt.err (!%p748_p1)
}
  0x24   :  { %60 = dma.hbm_to_vmem [thread:$0]  %s1052_s3, 256, %s55_s12, [#allocation9], %s849_s7, %s849_s7, %s850_s8  }
  0x25   :  { %s752_s26 = scalar_lea.hbm %s1049_s0, 32 }
  0x26   :  { %p753_p2 = scmp.ne.s32.totalorder %s1049_s0, %s752_s26  ;;  %p756_p3 = scmp.lt.u32.totalorder %s752_s26, %s1049_s0 }
  0x28   :  { %p758_p4 = pnand %p756_p3, %p753_p2 }
  0x2a   :  { %761 = shalt.err (!%p758_p4)
}
  0x2b   :  { %s762_s9 = scalar_lea.vmem %s22_s14, 32  ;;  %p767_p6 = scmp.lt.s32.totalorder %s22_s14, %s22_s14 }
  0x2c   :  { %p763_p5 = scmp.ne.s32.totalorder %s22_s14, %s762_s9  ;;  %p768_p7 = scmp.lt.s32.totalorder %s762_s9, %s762_s9 }
  0x2e   :  { %p769_p8 = por %p768_p7, %p767_p6 }
  0x30   :  { %p770_p9 = pnand %p769_p8, %p763_p5 }
  0x32   :  { %773 = shalt.err (!%p770_p9)
}
  0x33   :  { %24 = dma.hbm_to_vmem [thread:$0]  %s1049_s0, 32, %s22_s14, [#allocation3]  }
  0x34   :  { %s853_s11 = smov [#allocation7]   ;;  %s774_s16 = scalar_lea.hbm %s1051_s2, 2048 }
  0x35   :  { %s42_s12 = sshll.u32 %s853_s11, 4  ;;  %p775_p10 = scmp.ne.s32.totalorder %s1051_s2, %s774_s16  ;;  %s43_s12 = int_to_ptr.vmem [resolvable:$true] %s42_s12 }
  0x36   :  { %p778_p11 = scmp.lt.u32.totalorder %s774_s16, %s1051_s2 }
  0x38   :  { %p780_p12 = pnand %p778_p11, %p775_p10 }
  0x3a   :  { %783 = shalt.err (!%p780_p12)
}
  0x3b   :  { %s784_s21 = scalar_lea.vmem %s43_s12, 2048  ;;  %p789_p0 = scmp.lt.s32.totalorder %s43_s12, %s43_s12 }
  0x3c   :  { %p785_p13 = scmp.ne.s32.totalorder %s43_s12, %s784_s21  ;;  %p790_p1 = scmp.lt.s32.totalorder %s784_s21, %s784_s21 }
  0x3e   :  { %p791_p2 = por %p790_p1, %p789_p0 }
  0x40   :  { %p792_p3 = pnand %p791_p2, %p785_p13 }
  0x42   :  { %795 = shalt.err (!%p792_p3)
}
  0x43   :  { %s854_s0 = smov 256   ;;  %s855_s14 = smov 16  }
  0x44   :  { %48 = dma.hbm_to_vmem [thread:$0]  %s1051_s2, 2048, %s43_s12, [#allocation6], %s854_s0, %s854_s0, %s855_s14  }
  0x45   :  { %s856_s23 = smov [#allocation10]   ;;  %s796_s27 = scalar_lea.hbm %s1053_s4, 1024 }
  0x46   :  { %s66_s24 = sshll.u32 %s856_s23, 4  ;;  %p797_p4 = scmp.ne.s32.totalorder %s1053_s4, %s796_s27  ;;  %s67_s24 = int_to_ptr.vmem [resolvable:$true] %s66_s24 }
  0x47   :  { %p800_p5 = scmp.lt.u32.totalorder %s796_s27, %s1053_s4 }
  0x49   :  { %p802_p6 = pnand %p800_p5, %p797_p4 }
  0x4b   :  { %805 = shalt.err (!%p802_p6)
}
  0x4c   :  { %s806_s3 = scalar_lea.vmem %s67_s24, 1024  ;;  %p811_p8 = scmp.lt.s32.totalorder %s67_s24, %s67_s24 }
  0x4d   :  { %p807_p7 = scmp.ne.s32.totalorder %s67_s24, %s806_s3  ;;  %p812_p9 = scmp.lt.s32.totalorder %s806_s3, %s806_s3 }
  0x4f   :  { %p813_p10 = por %p812_p9, %p811_p8 }
  0x51   :  { %p814_p11 = pnand %p813_p10, %p807_p7 }
  0x53   :  { %817 = shalt.err (!%p814_p11)
}
  0x54   :  { %72 = dma.hbm_to_vmem [thread:$0]  %s1053_s4, 1024, %s67_s24, [#allocation9], %s849_s7, %s849_s7, %s850_s8  }
  0x55   :  { %840 = dma.done.wait [#allocation3], 32  }
  0x56   :  { %841 = vsyncadd [#allocation3], 4294967264 }
  0x57   :  { %842 = dma.done.wait [#allocation6], 2304  }
  0x58   :  { %843 = vsyncadd [#allocation6], 4294964992 }
  0x59   :  { %844 = dma.done.wait [#allocation9], 1280  }
  0x5a   :  { %845 = vsyncadd [#allocation9], 4294966016  ;;  %v857_v0 = vmov 0.0   ;;  %v99_v1 = vld [vmem:[#allocation7 + $0x8] sm:$0xff]  ;;  %v101_v2 = vld [vmem:[#allocation7 + $0x18] sm:$0xff]  ;;  %vm125_vm0 = vcmask 523264   ;;  %v115_v26 = vlaneseq }
  0x5b   :  { %193 = vmatprep.mubr.f32.mxu0 %v857_v0  ;;  %v98_v3 = vld [vmem:[#allocation7] sm:$0xff]  ;;  %v646_v4 = vpack.c.bf16 %v101_v2, %v99_v1  ;;  %v100_v5 = vld [vmem:[#allocation7 + $0x10] sm:$0xff]  ;;  %v103_v6 = vld [vmem:[#allocation7 + $0x28] sm:$0xff]  ;;  %vm200_vm1 = vcmask 517120   ;;  %vm227_vm2 = vcmask 130048   ;;  %s858_s15 = smov 64  }
  0x5c   :  { %v105_v7 = vld [vmem:[#allocation7 + $0x38] sm:$0xff]  ;;  %v648_v8 = vpack.c.bf16 %v100_v5, %v98_v3  ;;  %v102_v10 = vld [vmem:[#allocation7 + $0x20] sm:$0xff]  ;;  %v104_v11 = vld [vmem:[#allocation7 + $0x30] sm:$0xff]  ;;  %v971_v27 = vshrl.u32 %v115_v26, 7  ;;  %v859_v57 = vmov 1966171168  }
  0x5d   :  { %v650_v9 = vpack.c.bf16 %v105_v7, %v103_v6  ;;  %v107_v12 = vld [vmem:[#allocation7 + $0x48] sm:$0xff]  ;;  %647 = vmatprep.subr.bf16.mxu0 %v646_v4  ;;  %v109_v13 = vld [vmem:[#allocation7 + $0x58] sm:$0xff]  ;;  %v652_v14 = vpack.c.bf16 %v104_v11, %v102_v10  ;;  %v106_v16 = vld [vmem:[#allocation7 + $0x40] sm:$0xff]  ;;  %v311_v58 = vunpack.c.l.s4 %v859_v57  ;;  %vm349_vm3 = vcmask 1041408   ;;  %s863_s1 = smov [#allocation11]  }
  0x5e   :  { %649 = vmatpush1.bf16.msra.mxu0 %v648_v8  ;;  %v654_v15 = vpack.c.bf16 %v109_v13, %v107_v12  ;;  %v108_v17 = vld [vmem:[#allocation7 + $0x50] sm:$0xff]  ;;  %v111_v18 = vld [vmem:[#allocation7 + $0x68] sm:$0xff]  ;;  %v113_v19 = vld [vmem:[#allocation7 + $0x78] sm:$0xff]  ;;  %v974_v28 = vsub.s32 0, %v971_v27  ;;  %v356_v13 = vand.u32 127, %v115_v26  ;;  %vm365_vm4 = vcmask 1041409  }
  0x5f   :  { %651 = vmatprep.subr.bf16.mxu0 %v650_v9  ;;  %v656_v20 = vpack.c.bf16 %v108_v17, %v106_v16  ;;  %v658_v21 = vpack.c.bf16 %v113_v19, %v111_v18  ;;  %v110_v22 = vld [vmem:[#allocation7 + $0x60] sm:$0xff]  ;;  %v112_v23 = vld [vmem:[#allocation7 + $0x70] sm:$0xff]  ;;  %v97_v25 = vld [vmem:[#allocation2] sm:$0x3]  ;;  %v312_v59 = vunpack.c.0.s8 %v311_v58  ;;  %vm368_vm5 = vcmask 58368   ;;  %s592_s22 = sshll.u32 %s863_s1, 4  ;;  %s593_s22 = int_to_ptr.vmem [resolvable:$true] %s592_s22 }
  0x60   :  { %v660_v24 = vpack.c.bf16 %v112_v23, %v110_v22  ;;  %v979_v29 = vld [vmem:[%s1054_s5] ss:$8 sm:$0x3]  ;;  %v226_v36 = vld [vmem:[#allocation8 + $0x8] sm:$0xff]  ;;  %v223_v37 = vld [vmem:[#allocation5] sm:$0xff]  ;;  %vm862_vm6 = vmmov 0   ;;  %p823_p13 = scmp.lt.s32.totalorder %s593_s22, %s593_s22 }
  0x61   :  { %v118_v30 = vrot.slane %v979_v29, %v974_v28  ;;  %v225_v35 = vld [vmem:[#allocation8] sm:$0xff]  ;;  %624 = vmatprep.mubr.msk.f32.mxu1 %vm227_vm2, %v223_v37  ;;  %v224_v39 = vld [vmem:[#allocation5 + $0x8] sm:$0xff]  ;;  %v315_v60 = vsub.s32 %v312_v59, %v971_v27  ;;  %s818_s23 = scalar_lea.vmem %s593_s22, 32 }
  0x62   :  { %653 = vmatpush1.bf16.msra.mxu0 %v652_v14  ;;  %v662_v38 = vpack.c.bf16 %v226_v36, %v225_v35  ;;  %v93_v50 = vld [vmem:[%s1054_s5 + $0x3] ss:$0 sm:$0xff]  ;;  %v94_v53 = vld [vmem:[%s1054_s5 + $0x4] ss:$0 sm:$0xff]  ;;  %v91_v63 = vld [vmem:[%s1054_s5 + $0x1] ss:$0 sm:$0xff]  ;;  %v359_v14 = vsub.s32 %v356_v13, %v971_v27  ;;  %p819_p12 = scmp.ne.s32.totalorder %s593_s22, %s818_s23  ;;  %p824_p0 = scmp.lt.s32.totalorder %s818_s23, %s818_s23 }
  0x63   :  { %655 = vmatprep.subr.bf16.mxu0 %v654_v15 }
  0x64   :  { %663 = vmatprep.subr.bf16.mxu1 %v662_v38  ;;  %p825_p1 = por %p824_p0, %p823_p13 }
  0x65   :  { %665 = vmatpush3.bf16.msra.mxu1 %v662_v38 }
  0x66   :  { %657 = vmatpush1.bf16.msra.mxu0 %v656_v20  ;;  %p826_p2 = pnand %p825_p1, %p819_p12 }
  0x67   :  { %659 = vmatprep.subr.bf16.mxu0 %v658_v21  ;;  %v860_v21 = vmov 0  }
  0x68   :  { %625 = vmatmul.mubr.msk.f32.vlgmr.msra.gmra.mrb[0].mxu1 %vm227_vm2, %v224_v39  ;;  %695 = vset.pattern.permute.xlu1 %v860_v21 }
  0x69   :  { %694 = vset.pattern.permute.xlu0 %v860_v21  ;;  %643 = vmatprep.mubr.msk.f32.mxu1 %vm862_vm6, %v857_v0  ;;  %v96_v0 = vld [vmem:[%s1054_s5 + $0x6] ss:$0 sm:$0xff] }
  0x6a   :  { %661 = vmatpush1.bf16.msra.mxu0 %v660_v24  ;;  %v121_v24 = vsub.s32 1, %v971_v27 }
  0x6d   :  { %603 = vmatmul.mubr.msk.f32.vlgmr.msra.gmra.mrb[0].mxu0 %vm125_vm0, %v97_v25 }
 0x13b   :  { %v626_v48 = vpop.f32.mrb[0].mxu1 }
 0x13c   :  { %v300_v51 = vpop.f32.mrb[1].mxu1  ;;  %v1000_v5 = vadd.f32 %v626_v48, %v91_v63  ;;  %v122_v48 = vrot.slane %v979_v29, %v121_v24 }
 0x13d   :  { %v998_v4 = vadd.f32 %v300_v51, %v91_v63 }
 0x140   :  { %v195_v31 = vpop.f32.mrb[0].mxu0 }
 0x141   :  { %v196_v32 = vadd.f32 %v195_v31, %v118_v30  ;;  %v983_v33 = vpop.f32.mrb[1].mxu0 }
 0x143   :  { %v201_v34 = vsel %vm200_vm1, %v196_v32, 0.0 }
 0x144   :  { %202 = vadd.xlane.f32.xlu0 %v201_v34 }
 0x1d1   :  { %v203_v40 = vpop.xlane.xlu0 %202 }
 0x1d2   :  { %v205_v41 = vmul.f32 0.015625, %v203_v40 }
 0x1d4   :  { %v206_v42 = vsub.f32 %v196_v32, %v205_v41 }
 0x1d6   :  { %v207_v43 = vmul.f32 %v206_v42, %v206_v42 }
 0x1d8   :  { %v208_v44 = vsel %vm200_vm1, %v207_v43, 0.0 }
 0x1d9   :  { %209 = vadd.xlane.f32.xlu0 %v208_v44 }
 0x266   :  { %v210_v45 = vpop.xlane.xlu0 %209 }
 0x267   :  { %v211_v46 = vmul.f32 0.015625, %v210_v45 }
 0x269   :  { %v212_v47 = vadd.f32 1e-05, %v211_v46 }
 0x26b   :  { %696 = vrsqrt.f32 %v212_v47 }
 0x275   :  { %v697_v49 = vpop.eup %696 }
 0x276   :  { %v214_v52 = vmul.f32 %v697_v49, %v206_v42 }
 0x278   :  { %v215_v54 = vmul.f32 %v214_v52, %v93_v50  ;;  %v198_v50 = vadd.f32 %v983_v33, %v122_v48 }
 0x27a   :  { %v216_v55 = vadd.f32 %v215_v54, %v94_v53 }
 0x27c   :  { %v217_v56 = vmul.f32 0.125, %v216_v55 }
 0x27e   :  { %219 = vrot.lane.b32.xlu1 %v217_v56, %s858_s15 }
 0x2f0   :  { %v220_v61 = vpop.permute.xlu1 %219 }
 0x2f1   :  { %v222_v62 = vsel %vm125_vm0, 0.0, %v220_v61 }
 0x2f2   :  { %v316_v1 = vrot.slane %v222_v62, %v315_v60  ;;  %v348_v11 = vmul.f32 %v222_v62, %v196_v32 }
 0x2f4   :  { %v317_v2 = vcombine.high %v316_v1, %v316_v1  ;;  %v324_v3 = vrot.slane %v316_v1, %v315_v60  ;;  %v350_v12 = vsel %vm349_vm3, %v348_v11, 0.0 }
 0x2f6   :  { %v335_v6 = vrot.slane %v324_v3, %v974_v28  ;;  %v331_v7 = vrot.slane %v317_v2, %v315_v60 }
 0x2f8   :  { %v342_v8 = vmul.f32 %v335_v6, %v998_v4  ;;  %v339_v9 = vrot.slane %v331_v7, %v974_v28 }
 0x2fa   :  { %344 = vadd.xlane.f32.xlu1 %v342_v8  ;;  %v343_v10 = vmul.f32 %v339_v9, %v1000_v5 }
 0x2fc   :  { %346 = vadd.xlane.f32.xlu0 %v343_v10 }
 0x300   :  { %351 = vadd.xlane.f32.xlu0 %v350_v12 }
 0x387   :  { %v345_v15 = vpop.xlane.xlu1 %344 }
 0x388   :  { %v360_v17 = vrot.slane %v345_v15, %v359_v14 }
 0x389   :  { %v347_v16 = vpop.xlane.xlu0 %346 }
 0x38a   :  { %v364_v18 = vrot.slane %v347_v16, %v359_v14 }
 0x38c   :  { %v366_v19 = vsel %vm365_vm4, %v364_v18, %v360_v17 }
 0x38d   :  { %v369_v20 = vsel %vm368_vm5, %v366_v19, -inf  ;;  %v352_v22 = vpop.xlane.xlu0 %351 }
 0x38e   :  { %370 = vmax.xlane.f32.xlu0 %v369_v20 }
 0x41b   :  { %v371_v23 = vpop.xlane.xlu0 %370 }
 0x41c   :  { %v372_v25 = vmax.f32 %v371_v23, %v352_v22 }
 0x41e   :  { %v377_v26 = vrot.slane %v372_v25, %v974_v28  ;;  %v381_v30 = vrot.slane %v372_v25, %v121_v24  ;;  %v390_v31 = vsub.f32 %v352_v22, %v372_v25  ;;  %v501_v25 = vld [vmem:[#allocation10] sm:$0xff] }
 0x420   :  { %v384_v32 = vsub.f32 %v345_v15, %v377_v26  ;;  %v385_v34 = vsub.f32 %v347_v16, %v381_v30  ;;  %v391_v44 = vmul.f32 1.442695, %v390_v31  ;;  %v502_v26 = vld [vmem:[#allocation10 + $0x8] sm:$0xff]  ;;  %v861_v31 = vmov 0.0|0.0  }
 0x421   :  { %v667_v30 = vpack.c.bf16 %v502_v26, %v501_v25  ;;  %666 = vmatprep.subr.bf16.mxu1 %v861_v31 }
 0x422   :  { %v386_v35 = vmul.f32 1.442695, %v384_v32  ;;  %v388_v36 = vmul.f32 1.442695, %v385_v34  ;;  %v503_v32 = vld [vmem:[#allocation10 + $0x10] sm:$0xff]  ;;  %v504_v34 = vld [vmem:[#allocation10 + $0x18] sm:$0xff] }
 0x423   :  { %668 = vmatpush3.bf16.msra.mxu1 %v667_v30 }
 0x424   :  { %698 = vpow2.f32 %v386_v35  ;;  %669 = vmatprep.subr.bf16.mxu1 %v861_v31  ;;  %v670_v35 = vpack.c.bf16 %v504_v34, %v503_v32 }
 0x425   :  { %700 = vpow2.f32 %v388_v36  ;;  %v505_v36 = vld [vmem:[#allocation10 + $0x20] sm:$0xff] }
 0x426   :  { %702 = vpow2.f32 %v391_v44 }
 0x427   :  { %671 = vmatpush3.bf16.msra.mxu1 %v670_v35 }
 0x428   :  { %672 = vmatprep.subr.bf16.mxu1 %v861_v31 }
 0x42e   :  { %v699_v37 = vpop.eup %698 }
 0x42f   :  { %v701_v38 = vpop.eup %700  ;;  %396 = vperm.xlu0 %694, %v699_v37  }
 0x430   :  { %399 = vperm.xlu1 %695, %v701_v38   ;;  %v703_v45 = vpop.eup %702 }
 0x4ae   :  { %v397_v39 = vpop.permute.xlu0 %396 }
 0x4af   :  { %v400_v40 = vpop.permute.xlu1 %399  ;;  %v404_v41 = vrot.slane %v397_v39, %v359_v14  ;;  %v507_v39 = vld [vmem:[#allocation10 + $0x30] sm:$0xff] }
 0x4b0   :  { %v408_v42 = vrot.slane %v400_v40, %v359_v14  ;;  %v508_v40 = vld [vmem:[#allocation10 + $0x38] sm:$0xff] }
 0x4b2   :  { %v409_v27 = vsel %vm365_vm4, %v408_v42, %v404_v41  ;;  %v676_v41 = vpack.c.bf16 %v508_v40, %v507_v39 }
 0x4b3   :  { %v411_v43 = vsel %vm368_vm5, %v409_v27, 0.0 }
 0x4b4   :  { %412 = vadd.xlane.f32.xlu1 %v411_v43 }
 0x541   :  { %v413_v46 = vpop.xlane.xlu1 %412 }
 0x542   :  { %v414_v47 = vadd.f32 %v703_v45, %v413_v46 }
 0x544   :  { %704 = vrcp.f32 %v414_v47  ;;  %v95_v47 = vld [vmem:[%s1054_s5 + $0x5] ss:$0 sm:$0xff] }
 0x54e   :  { %v705_v49 = vpop.eup %704 }
 0x54f   :  { %v424_v51 = vrot.slane %v705_v49, %v121_v24  ;;  %v429_v52 = vmul.f32 %v705_v49, %v703_v45  ;;  %v420_v54 = vrot.slane %v705_v49, %v974_v28 }
 0x551   :  { %v428_v53 = vmul.f32 %v701_v38, %v424_v51  ;;  %v456_v55 = vmul.f32 %v429_v52, %v198_v50  ;;  %v427_v56 = vmul.f32 %v699_v37, %v420_v54  ;;  %v506_v37 = vld [vmem:[#allocation10 + $0x28] sm:$0xff] }
 0x552   :  { %v673_v38 = vpack.c.bf16 %v506_v37, %v505_v36 }
 0x553   :  { %437 = vperm.xlu0 %694, %v428_v53   ;;  %v458_v9 = vrot.slane %v456_v55, 1 }
 0x554   :  { %674 = vmatpush3.bf16.msra.mxu1 %v673_v38 }
 0x555   :  { %675 = vmatprep.subr.bf16.mxu1 %v861_v31 }
 0x557   :  { %432 = vperm.xlu0 %694, %v427_v56  }
 0x558   :  { %677 = vmatpush3.bf16.msra.mxu1 %v676_v41 }
 0x5d2   :  { %v438_v57 = vpop.permute.xlu0 %437 }
 0x5d3   :  { %v441_v58 = vmul.f32 %v438_v57, %v1000_v5 }
 0x5d5   :  { %v449_v59 = vsel %vm125_vm0, %v441_v58, 0.0 }
 0x5d6   :  { %v450_v60 = vrot.slane %v449_v59, 4  ;;  %v433_v61 = vpop.permute.xlu0 %432 }
 0x5d7   :  { %v440_v29 = vmul.f32 %v433_v61, %v998_v4 }
 0x5d8   :  { %v451_v62 = vadd.f32 %v450_v60, %v449_v59 }
 0x5d9   :  { %v442_v33 = vsel %vm125_vm0, %v440_v29, 0.0 }
 0x5da   :  { %v452_v63 = vrot.slane %v451_v62, 2  ;;  %v443_v1 = vrot.slane %v442_v33, 4 }
 0x5dc   :  { %v453_v2 = vadd.f32 %v452_v63, %v451_v62  ;;  %v444_v28 = vadd.f32 %v443_v1, %v442_v33 }
 0x5de   :  { %v454_v3 = vrot.slane %v453_v2, 1  ;;  %v445_v6 = vrot.slane %v444_v28, 2 }
 0x5e0   :  { %v455_v7 = vadd.f32 %v454_v3, %v453_v2  ;;  %v446_v8 = vadd.f32 %v445_v6, %v444_v28 }
 0x5e2   :  { %v447_v10 = vrot.slane %v446_v8, 1  ;;  %v462_v5 = vadd.f32 %v458_v9, %v455_v7 }
 0x5e4   :  { %v448_v11 = vadd.f32 %v447_v10, %v446_v8  ;;  %v465_v13 = vrot.slane %v462_v5, 7 }
 0x5e6   :  { %v461_v12 = vadd.f32 %v456_v55, %v448_v11  ;;  %v92_v55 = vld [vmem:[%s1054_s5 + $0x2] ss:$0 sm:$0xff] }
 0x5e8   :  { %v466_v14 = vsel %vm365_vm4, %v465_v13, %v461_v12 }
 0x5e9   :  { %v468_v4 = vsel %vm200_vm1, %v466_v14, 0.0 }
 0x5ea   :  { %469 = vadd.xlane.f32.xlu0 %v468_v4 }
 0x677   :  { %v470_v15 = vpop.xlane.xlu0 %469 }
 0x678   :  { %v471_v16 = vmul.f32 0.015625, %v470_v15 }
 0x67a   :  { %v473_v17 = vrot.slane %v471_v16, 1  ;;  %v476_v18 = vsub.f32 %v461_v12, %v471_v16 }
 0x67c   :  { %v477_v19 = vsub.f32 %v462_v5, %v473_v17  ;;  %v478_v21 = vmul.f32 %v476_v18, %v476_v18 }
 0x67e   :  { %v479_v20 = vmul.f32 %v477_v19, %v477_v19 }
 0x680   :  { %v482_v22 = vrot.slane %v479_v20, 7 }
 0x682   :  { %v483_v23 = vsel %vm365_vm4, %v482_v22, %v478_v21 }
 0x683   :  { %v485_v24 = vsel %vm200_vm1, %v483_v23, 0.0 }
 0x684   :  { %486 = vadd.xlane.f32.xlu1 %v485_v24 }
 0x711   :  { %v487_v42 = vpop.xlane.xlu1 %486 }
 0x712   :  { %v488_v27 = vmul.f32 0.015625, %v487_v42 }
 0x714   :  { %v489_v43 = vadd.f32 1e-05, %v488_v27 }
 0x716   :  { %706 = vrsqrt.f32 %v489_v43 }
 0x720   :  { %v707_v44 = vpop.eup %706 }
 0x721   :  { %v492_v45 = vrot.slane %v707_v44, 1  ;;  %v495_v46 = vmul.f32 %v707_v44, %v476_v18 }
 0x723   :  { %v496_v48 = vmul.f32 %v492_v45, %v477_v19  ;;  %v497_v49 = vmul.f32 %v495_v46, %v95_v47 }
 0x725   :  { %v498_v50 = vmul.f32 %v496_v48, %v95_v47  ;;  %v499_v52 = vadd.f32 %v497_v49, %v96_v0 }
 0x727   :  { %v500_v51 = vadd.f32 %v498_v50, %v96_v0 }
 0x729   :  { %v511_v53 = vrot.slane %v500_v51, 7 }
 0x72b   :  { %v512_v54 = vsel %vm365_vm4, %v511_v53, %v499_v52 }
 0x72c   :  { %644 = vmatmul.mubr.msk.f32.vlgmr.msra.gmra.mrb[2].mxu1 %vm125_vm0, %v512_v54 }
 0x7ff   :  { %v581_v56 = vpop.f32.mrb[2].mxu1 }
 0x800   :  { %v582_v57 = vadd.f32 %v581_v56, %v92_v55  ;;  %v645_v58 = vpop.f32.mrb[3].mxu1 }
 0x802   :  { %585 = vst [vmem:[#allocation11] sm:$0x3] %v582_v57 }
 0x803   :  { %829 = shalt.err (!%p826_p2)
}
 0x804   :  { %s830_s26 = scalar_lea.hbm %s1055_s6, 32 }
 0x805   :  { %p831_p3 = scmp.ne.s32.totalorder %s1055_s6, %s830_s26  ;;  %p834_p4 = scmp.lt.u32.totalorder %s830_s26, %s1055_s6 }
 0x807   :  { %p836_p5 = pnand %p834_p4, %p831_p3 }
 0x809   :  { %839 = shalt.err (!%p836_p5)
}
 0x80a   :  { %595 = dma.vmem_to_hbm [thread:$0]  %s593_s22, 32, %s1055_s6, [#allocation4]  }
 0x80b   :  { %846 = dma.done.wait [#allocation4], 32  }
 0x80c   :  { %847 = vsyncadd [#allocation4], 4294967264 }
 0x80d   :  { %599 = vsyncpa [#allocation3], 1 }
 0x80e   :  { %600 = vsyncpa [#allocation6], 1 }
 0x80f   :  { %601 = vsyncpa [#allocation9], 1 }
 0x810   :  { %602 = vsyncpa [#allocation4], 1 }

</bundles_post_ra>
